<compile_context>
chip_gen: v7x
topology: tpu7x:2x2x1
jax: 0.10.0
libtpu: 0.0.40
codegen_flags: <defaults>
</compile_context>

<pallas_src>
import math

import jax
import jax.numpy as jnp
from jax.experimental import pallas as pl
from jax.experimental.pallas import tpu as pltpu  # noqa: F401  (TPU backend)

MODEL_DIM = 32
N_HEADS = 4
HEAD_DIM = MODEL_DIM // N_HEADS
HIDDEN = MODEL_DIM * 4
SEQ = 8
BATCH = 2
TOKENS = BATCH * SEQ
LN_EPS = 1e-5


def _layernorm(y, gamma, beta):
    mu = jnp.mean(y, axis=-1, keepdims=True)
    var = jnp.mean((y - mu) ** 2, axis=-1, keepdims=True)
    return (y - mu) * jax.lax.rsqrt(var + LN_EPS) * gamma + beta


def bert_block_kernel(x_ref, bias_ref,
                      wqkv_ref, bqkv_ref, wo_ref, bo_ref,
                      g1_ref, be1_ref,
                      w1_ref, bm1_ref, w2_ref, bm2_ref,
                      g2_ref, be2_ref,
                      o_ref):
    x = x_ref[...]                              # (B*S, D) f32 token slab
    x_bf = x.astype(jnp.bfloat16)

    # ---- fused QKV projection: one (16,32) @ (32,96) bf16 matmul ----
    # (Q columns of wqkv/bqkv already carry the 1/sqrt(HEAD_DIM) scale.)
    qkv = jnp.dot(x_bf, wqkv_ref[...], preferred_element_type=jnp.float32)
    qkv = qkv + bqkv_ref[...]
    q = qkv[:, 0 * MODEL_DIM:1 * MODEL_DIM].astype(jnp.bfloat16)   # (B*S, D)
    # Single hoisted transpose of the K slab -> per-head RHS is a sublane
    # sub-view and the score matmul is a plain (M,K)@(K,N) dot.
    k_t = jnp.transpose(
        qkv[:, 1 * MODEL_DIM:2 * MODEL_DIM]).astype(jnp.bfloat16)  # (D, B*S)
    v = qkv[:, 2 * MODEL_DIM:3 * MODEL_DIM].astype(jnp.bfloat16)   # (B*S, D)

    # ---- multi-head self-attention over the whole (B*S) slab ----
    # bias_ref is 0 for same-batch (i, j) token pairs and -1e30 across batches,
    # so both batch elements share one (16,16) score matmul per head.
    bias = bias_ref[...]
    acc = jnp.zeros((TOKENS, MODEL_DIM), jnp.float32)
    for h in range(N_HEADS):                    # static unroll over heads
        lo = h * HEAD_DIM
        qh = q[:, lo:lo + HEAD_DIM]             # (B*S, hd) lane slice
        kh_t = k_t[lo:lo + HEAD_DIM, :]         # (hd, B*S) sublane slice
        vh = v[:, lo:lo + HEAD_DIM]             # (B*S, hd)
        s = jnp.dot(qh, kh_t, preferred_element_type=jnp.float32) + bias
        s = s - jnp.max(s, axis=-1, keepdims=True)
        p = jnp.exp(s)                          # unnormalized probs, f32
        inv_denom = pl.reciprocal(
            jnp.sum(p, axis=-1, keepdims=True), approx=True)       # EUP slot
        pv = jnp.dot(p.astype(jnp.bfloat16), vh,
                     preferred_element_type=jnp.float32)            # (B*S, hd)
        head = (pv * inv_denom).astype(jnp.bfloat16)
        # accumulate straight through the Wo row-slice -> no scratch store/load
        acc = acc + jnp.dot(head, wo_ref[lo:lo + HEAD_DIM, :],
                            preferred_element_type=jnp.float32)

    attn = acc + bo_ref[...]

    # dropout_p = 0.0 (eval) -> identity; residual + LayerNorm 1 (f32)
    h1 = _layernorm(attn + x, g1_ref[...], be1_ref[...])

    # ---- MLP: Linear(D, 4D) -> relu -> Linear(4D, D) ----
    hid = jnp.dot(h1.astype(jnp.bfloat16), w1_ref[...],
                  preferred_element_type=jnp.float32) + bm1_ref[...]
    hid = jnp.maximum(hid, 0.0)
    ffn = jnp.dot(hid.astype(jnp.bfloat16), w2_ref[...],
                  preferred_element_type=jnp.float32) + bm2_ref[...]

    # residual + LayerNorm 2 (f32)
    out = _layernorm(ffn + h1, g2_ref[...], be2_ref[...])
    # NOTE: the (16, 32) store uses 32/128 lanes; a lane-dense repack would
    # cost more than the couple of masked stores it removes at this size.
    o_ref[...] = out.astype(o_ref.dtype)


@jax.jit
def bert_block(x, kparams):
    B, S, D = x.shape
    x2 = x.reshape(B * S, D)                    # free reshape outside the kernel

    # additive block mask: tokens only attend within their own batch element
    # (static given B, S -> constant-folded under jit)
    batch_ids = jnp.repeat(jnp.arange(B, dtype=jnp.int32), S)
    batch_bias = jnp.where(batch_ids[:, None] == batch_ids[None, :],
                           0.0, -1e30).astype(jnp.float32)

    order = ["wqkv", "bqkv", "wo", "bo", "g1", "be1",
             "w1", "bm1", "w2", "bm2", "g2", "be2"]
    args = [kparams[n] for n in order]

    out = pl.pallas_call(
        bert_block_kernel,
        out_shape=jax.ShapeDtypeStruct((B * S, D), x.dtype),
    )(x2, batch_bias, *args)
    return out.reshape(B, S, D)


def init_params(key):
    ks = jax.random.split(key, 8)
    std = 0.02
    return {
        "wq": jax.random.normal(ks[0], (MODEL_DIM, MODEL_DIM), jnp.float32) * std,
        "bq": jnp.zeros((1, MODEL_DIM), jnp.float32),
        "wk": jax.random.normal(ks[1], (MODEL_DIM, MODEL_DIM), jnp.float32) * std,
        "bk": jnp.zeros((1, MODEL_DIM), jnp.float32),
        "wv": jax.random.normal(ks[2], (MODEL_DIM, MODEL_DIM), jnp.float32) * std,
        "bv": jnp.zeros((1, MODEL_DIM), jnp.float32),
        "wo": jax.random.normal(ks[3], (MODEL_DIM, MODEL_DIM), jnp.float32) * std,
        "bo": jax.random.normal(ks[4], (1, MODEL_DIM), jnp.float32) * std,
        "g1": jnp.ones((1, MODEL_DIM), jnp.float32),
        "be1": jnp.zeros((1, MODEL_DIM), jnp.float32),
        "w1": jax.random.normal(ks[5], (MODEL_DIM, HIDDEN), jnp.float32) * std,
        "bm1": jax.random.normal(ks[6], (1, HIDDEN), jnp.float32) * std,
        "w2": jax.random.normal(ks[7], (HIDDEN, MODEL_DIM), jnp.float32) * std,
        "bm2": jnp.zeros((1, MODEL_DIM), jnp.float32),
        "g2": jnp.ones((1, MODEL_DIM), jnp.float32),
        "be2": jnp.zeros((1, MODEL_DIM), jnp.float32),
    }


def pack_params(p):
    """Fuse QKV (softmax scale folded into Q), cast matmul weights to bf16."""
    scale = 1.0 / math.sqrt(HEAD_DIM)
    return {
        "wqkv": jnp.concatenate(
            [p["wq"] * scale, p["wk"], p["wv"]], axis=1).astype(jnp.bfloat16),
        "bqkv": jnp.concatenate([p["bq"] * scale, p["bk"], p["bv"]], axis=1),
        "wo": p["wo"].astype(jnp.bfloat16), "bo": p["bo"],
        "g1": p["g1"], "be1": p["be1"],
        "w1": p["w1"].astype(jnp.bfloat16), "bm1": p["bm1"],
        "w2": p["w2"].astype(jnp.bfloat16), "bm2": p["bm2"],
        "g2": p["g2"], "be2": p["be2"],
    }


def bert_block_ref(x, p):
    """Pure-JAX f32 reference mirroring the PyTorch forward (mask=None, eval)."""
    def ln(y, g, b):
        mu = y.mean(-1, keepdims=True)
        var = ((y - mu) ** 2).mean(-1, keepdims=True)
        return (y - mu) / jnp.sqrt(var + LN_EPS) * g + b

    B, S, D = x.shape
    q = x @ p["wq"] + p["bq"][0]
    k = x @ p["wk"] + p["bk"][0]
    v = x @ p["wv"] + p["bv"][0]
    qh = q.reshape(B, S, N_HEADS, HEAD_DIM).transpose(0, 2, 1, 3)
    kh = k.reshape(B, S, N_HEADS, HEAD_DIM).transpose(0, 2, 1, 3)
    vh = v.reshape(B, S, N_HEADS, HEAD_DIM).transpose(0, 2, 1, 3)
    s = (qh @ kh.transpose(0, 1, 3, 2)) / math.sqrt(HEAD_DIM)
    a = jax.nn.softmax(s, axis=-1)
    o = (a @ vh).transpose(0, 2, 1, 3).reshape(B, S, D)
    attn = o @ p["wo"] + p["bo"][0]
    h1 = ln(attn + x, p["g1"][0], p["be1"][0])
    hid = jnp.maximum(h1 @ p["w1"] + p["bm1"][0], 0.0)
    ffn = hid @ p["w2"] + p["bm2"][0]
    return ln(ffn + h1, p["g2"][0], p["be2"][0])


if __name__ == "__main__":
    key = jax.random.PRNGKey(0)
    kx, kp = jax.random.split(key)
    x = jax.random.normal(kx, (BATCH, SEQ, MODEL_DIM), jnp.float32)
    params = init_params(kp)

    out = bert_block(x, pack_params(params))
    out = jax.block_until_ready(out)

    ref = bert_block_ref(x, params)
    assert out.shape == (BATCH, SEQ, MODEL_DIM)
    max_err = float(jnp.max(jnp.abs(out - ref)))
    # bf16 matmul operands + approx reciprocal -> relaxed tolerance vs f32 ref
    assert jnp.allclose(out, ref, atol=2e-2, rtol=2e-2), max_err
    print("KERNEL_OK")
</pallas_src>

<mosaic_0001>
module attributes {stable_mosaic.version = 11 : i64} {
  func.func @bert_block_kernel(%arg0: memref<16x32xf32, #tpu.memory_space<vmem>>, %arg1: memref<16x16xf32, #tpu.memory_space<vmem>>, %arg2: memref<32x96xbf16, #tpu.memory_space<vmem>>, %arg3: memref<1x96xf32, #tpu.memory_space<vmem>>, %arg4: memref<32x32xbf16, #tpu.memory_space<vmem>>, %arg5: memref<1x32xf32, #tpu.memory_space<vmem>>, %arg6: memref<1x32xf32, #tpu.memory_space<vmem>>, %arg7: memref<1x32xf32, #tpu.memory_space<vmem>>, %arg8: memref<32x128xbf16, #tpu.memory_space<vmem>>, %arg9: memref<1x128xf32, #tpu.memory_space<vmem>>, %arg10: memref<128x32xbf16, #tpu.memory_space<vmem>>, %arg11: memref<1x32xf32, #tpu.memory_space<vmem>>, %arg12: memref<1x32xf32, #tpu.memory_space<vmem>>, %arg13: memref<1x32xf32, #tpu.memory_space<vmem>>, %arg14: memref<16x32xf32, #tpu.memory_space<vmem>>) attributes {dimension_semantics = [], scalar_prefetch = 0 : i64, scratch_operands = 0 : i64, tpu.core_type = #tpu.core_type<tc>} {
    %c0 = arith.constant 0 : index
    %c0_0 = arith.constant 0 : index
    %0 = vector.load %arg0[%c0, %c0_0] : memref<16x32xf32, #tpu.memory_space<vmem>>, vector<16x32xf32>
    %1 = arith.truncf %0 : vector<16x32xf32> to vector<16x32xbf16>
    %c0_1 = arith.constant 0 : index
    %c0_2 = arith.constant 0 : index
    %2 = vector.load %arg2[%c0_1, %c0_2] : memref<32x96xbf16, #tpu.memory_space<vmem>>, vector<32x96xbf16>
    %cst = arith.constant dense<0.000000e+00> : vector<16x96xf32>
    %3 = tpu.matmul %1, %2, %cst {dimension_numbers = #tpu.dot_dimension_numbers<[1], [0], [0], [1], [0, 0, 1, 1], [], []>} : vector<16x32xbf16>, vector<32x96xbf16>, vector<16x96xf32> -> vector<16x96xf32>
    %c0_3 = arith.constant 0 : index
    %c0_4 = arith.constant 0 : index
    %4 = vector.load %arg3[%c0_3, %c0_4] : memref<1x96xf32, #tpu.memory_space<vmem>>, vector<1x96xf32>
    %5 = vector.broadcast %4 : vector<1x96xf32> to vector<16x96xf32>
    %6 = arith.addf %3, %5 : vector<16x96xf32>
    %7 = vector.extract_strided_slice %6 {offsets = [0, 0], sizes = [16, 32], strides = [1, 1]} : vector<16x96xf32> to vector<16x32xf32>
    %8 = arith.truncf %7 : vector<16x32xf32> to vector<16x32xbf16>
    %9 = vector.extract_strided_slice %6 {offsets = [0, 32], sizes = [16, 32], strides = [1, 1]} : vector<16x96xf32> to vector<16x32xf32>
    %10 = tpu.transpose %9, [1, 0] : vector<16x32xf32> -> vector<32x16xf32>
    %11 = arith.truncf %10 : vector<32x16xf32> to vector<32x16xbf16>
    %12 = vector.extract_strided_slice %6 {offsets = [0, 64], sizes = [16, 32], strides = [1, 1]} : vector<16x96xf32> to vector<16x32xf32>
    %13 = arith.truncf %12 : vector<16x32xf32> to vector<16x32xbf16>
    %c0_5 = arith.constant 0 : index
    %c0_6 = arith.constant 0 : index
    %14 = vector.load %arg1[%c0_5, %c0_6] : memref<16x16xf32, #tpu.memory_space<vmem>>, vector<16x16xf32>
    %cst_7 = arith.constant 0.000000e+00 : f32
    %15 = vector.broadcast %cst_7 : f32 to vector<16x32xf32>
    %16 = vector.extract_strided_slice %8 {offsets = [0, 0], sizes = [16, 8], strides = [1, 1]} : vector<16x32xbf16> to vector<16x8xbf16>
    %17 = vector.extract_strided_slice %11 {offsets = [0, 0], sizes = [8, 16], strides = [1, 1]} : vector<32x16xbf16> to vector<8x16xbf16>
    %18 = vector.extract_strided_slice %13 {offsets = [0, 0], sizes = [16, 8], strides = [1, 1]} : vector<16x32xbf16> to vector<16x8xbf16>
    %cst_8 = arith.constant dense<0.000000e+00> : vector<16x16xf32>
    %19 = tpu.matmul %16, %17, %cst_8 {dimension_numbers = #tpu.dot_dimension_numbers<[1], [0], [0], [1], [0, 0, 1, 1], [], []>} : vector<16x8xbf16>, vector<8x16xbf16>, vector<16x16xf32> -> vector<16x16xf32>
    %20 = arith.addf %19, %14 : vector<16x16xf32>
    %cst_9 = arith.constant dense<0xFF800000> : vector<16xf32>
    %21 = vector.multi_reduction <maximumf>, %20, %cst_9 [1] : vector<16x16xf32> to vector<16xf32>
    %22 = vector.shape_cast %21 : vector<16xf32> to vector<16x1xf32>
    %23 = vector.broadcast %22 : vector<16x1xf32> to vector<16x16xf32>
    %24 = arith.subf %20, %23 : vector<16x16xf32>
    %25 = math.exp %24 : vector<16x16xf32>
    %cst_10 = arith.constant dense<0.000000e+00> : vector<16xf32>
    %26 = vector.multi_reduction <add>, %25, %cst_10 [1] : vector<16x16xf32> to vector<16xf32>
    %27 = vector.shape_cast %26 : vector<16xf32> to vector<16x1xf32>
    %28 = tpu.reciprocal %27 {approx = true} : vector<16x1xf32> -> vector<16x1xf32>
    %29 = arith.truncf %25 : vector<16x16xf32> to vector<16x16xbf16>
    %cst_11 = arith.constant dense<0.000000e+00> : vector<16x8xf32>
    %30 = tpu.matmul %29, %18, %cst_11 {dimension_numbers = #tpu.dot_dimension_numbers<[1], [0], [0], [1], [0, 0, 1, 1], [], []>} : vector<16x16xbf16>, vector<16x8xbf16>, vector<16x8xf32> -> vector<16x8xf32>
    %31 = vector.broadcast %28 : vector<16x1xf32> to vector<16x8xf32>
    %32 = arith.mulf %30, %31 : vector<16x8xf32>
    %33 = arith.truncf %32 : vector<16x8xf32> to vector<16x8xbf16>
    %c0_12 = arith.constant 0 : index
    %c0_13 = arith.constant 0 : index
    %34 = vector.load %arg4[%c0_12, %c0_13] : memref<32x32xbf16, #tpu.memory_space<vmem>>, vector<8x32xbf16>
    %cst_14 = arith.constant dense<0.000000e+00> : vector<16x32xf32>
    %35 = tpu.matmul %33, %34, %cst_14 {dimension_numbers = #tpu.dot_dimension_numbers<[1], [0], [0], [1], [0, 0, 1, 1], [], []>} : vector<16x8xbf16>, vector<8x32xbf16>, vector<16x32xf32> -> vector<16x32xf32>
    %36 = arith.addf %15, %35 : vector<16x32xf32>
    %37 = vector.extract_strided_slice %8 {offsets = [0, 8], sizes = [16, 8], strides = [1, 1]} : vector<16x32xbf16> to vector<16x8xbf16>
    %38 = vector.extract_strided_slice %11 {offsets = [8, 0], sizes = [8, 16], strides = [1, 1]} : vector<32x16xbf16> to vector<8x16xbf16>
    %39 = vector.extract_strided_slice %13 {offsets = [0, 8], sizes = [16, 8], strides = [1, 1]} : vector<16x32xbf16> to vector<16x8xbf16>
    %cst_15 = arith.constant dense<0.000000e+00> : vector<16x16xf32>
    %40 = tpu.matmul %37, %38, %cst_15 {dimension_numbers = #tpu.dot_dimension_numbers<[1], [0], [0], [1], [0, 0, 1, 1], [], []>} : vector<16x8xbf16>, vector<8x16xbf16>, vector<16x16xf32> -> vector<16x16xf32>
    %41 = arith.addf %40, %14 : vector<16x16xf32>
    %cst_16 = arith.constant dense<0xFF800000> : vector<16xf32>
    %42 = vector.multi_reduction <maximumf>, %41, %cst_16 [1] : vector<16x16xf32> to vector<16xf32>
    %43 = vector.shape_cast %42 : vector<16xf32> to vector<16x1xf32>
    %44 = vector.broadcast %43 : vector<16x1xf32> to vector<16x16xf32>
    %45 = arith.subf %41, %44 : vector<16x16xf32>
    %46 = math.exp %45 : vector<16x16xf32>
    %cst_17 = arith.constant dense<0.000000e+00> : vector<16xf32>
    %47 = vector.multi_reduction <add>, %46, %cst_17 [1] : vector<16x16xf32> to vector<16xf32>
    %48 = vector.shape_cast %47 : vector<16xf32> to vector<16x1xf32>
    %49 = tpu.reciprocal %48 {approx = true} : vector<16x1xf32> -> vector<16x1xf32>
    %50 = arith.truncf %46 : vector<16x16xf32> to vector<16x16xbf16>
    %cst_18 = arith.constant dense<0.000000e+00> : vector<16x8xf32>
    %51 = tpu.matmul %50, %39, %cst_18 {dimension_numbers = #tpu.dot_dimension_numbers<[1], [0], [0], [1], [0, 0, 1, 1], [], []>} : vector<16x16xbf16>, vector<16x8xbf16>, vector<16x8xf32> -> vector<16x8xf32>
    %52 = vector.broadcast %49 : vector<16x1xf32> to vector<16x8xf32>
    %53 = arith.mulf %51, %52 : vector<16x8xf32>
    %54 = arith.truncf %53 : vector<16x8xf32> to vector<16x8xbf16>
    %c8 = arith.constant 8 : index
    %c0_19 = arith.constant 0 : index
    %55 = vector.load %arg4[%c8, %c0_19] : memref<32x32xbf16, #tpu.memory_space<vmem>>, vector<8x32xbf16>
    %cst_20 = arith.constant dense<0.000000e+00> : vector<16x32xf32>
    %56 = tpu.matmul %54, %55, %cst_20 {dimension_numbers = #tpu.dot_dimension_numbers<[1], [0], [0], [1], [0, 0, 1, 1], [], []>} : vector<16x8xbf16>, vector<8x32xbf16>, vector<16x32xf32> -> vector<16x32xf32>
    %57 = arith.addf %36, %56 : vector<16x32xf32>
    %58 = vector.extract_strided_slice %8 {offsets = [0, 16], sizes = [16, 8], strides = [1, 1]} : vector<16x32xbf16> to vector<16x8xbf16>
    %59 = vector.extract_strided_slice %11 {offsets = [16, 0], sizes = [8, 16], strides = [1, 1]} : vector<32x16xbf16> to vector<8x16xbf16>
    %60 = vector.extract_strided_slice %13 {offsets = [0, 16], sizes = [16, 8], strides = [1, 1]} : vector<16x32xbf16> to vector<16x8xbf16>
    %cst_21 = arith.constant dense<0.000000e+00> : vector<16x16xf32>
    %61 = tpu.matmul %58, %59, %cst_21 {dimension_numbers = #tpu.dot_dimension_numbers<[1], [0], [0], [1], [0, 0, 1, 1], [], []>} : vector<16x8xbf16>, vector<8x16xbf16>, vector<16x16xf32> -> vector<16x16xf32>
    %62 = arith.addf %61, %14 : vector<16x16xf32>
    %cst_22 = arith.constant dense<0xFF800000> : vector<16xf32>
    %63 = vector.multi_reduction <maximumf>, %62, %cst_22 [1] : vector<16x16xf32> to vector<16xf32>
    %64 = vector.shape_cast %63 : vector<16xf32> to vector<16x1xf32>
    %65 = vector.broadcast %64 : vector<16x1xf32> to vector<16x16xf32>
    %66 = arith.subf %62, %65 : vector<16x16xf32>
    %67 = math.exp %66 : vector<16x16xf32>
    %cst_23 = arith.constant dense<0.000000e+00> : vector<16xf32>
    %68 = vector.multi_reduction <add>, %67, %cst_23 [1] : vector<16x16xf32> to vector<16xf32>
    %69 = vector.shape_cast %68 : vector<16xf32> to vector<16x1xf32>
    %70 = tpu.reciprocal %69 {approx = true} : vector<16x1xf32> -> vector<16x1xf32>
    %71 = arith.truncf %67 : vector<16x16xf32> to vector<16x16xbf16>
    %cst_24 = arith.constant dense<0.000000e+00> : vector<16x8xf32>
    %72 = tpu.matmul %71, %60, %cst_24 {dimension_numbers = #tpu.dot_dimension_numbers<[1], [0], [0], [1], [0, 0, 1, 1], [], []>} : vector<16x16xbf16>, vector<16x8xbf16>, vector<16x8xf32> -> vector<16x8xf32>
    %73 = vector.broadcast %70 : vector<16x1xf32> to vector<16x8xf32>
    %74 = arith.mulf %72, %73 : vector<16x8xf32>
    %75 = arith.truncf %74 : vector<16x8xf32> to vector<16x8xbf16>
    %c16 = arith.constant 16 : index
    %c0_25 = arith.constant 0 : index
    %76 = vector.load %arg4[%c16, %c0_25] : memref<32x32xbf16, #tpu.memory_space<vmem>>, vector<8x32xbf16>
    %cst_26 = arith.constant dense<0.000000e+00> : vector<16x32xf32>
    %77 = tpu.matmul %75, %76, %cst_26 {dimension_numbers = #tpu.dot_dimension_numbers<[1], [0], [0], [1], [0, 0, 1, 1], [], []>} : vector<16x8xbf16>, vector<8x32xbf16>, vector<16x32xf32> -> vector<16x32xf32>
    %78 = arith.addf %57, %77 : vector<16x32xf32>
    %79 = vector.extract_strided_slice %8 {offsets = [0, 24], sizes = [16, 8], strides = [1, 1]} : vector<16x32xbf16> to vector<16x8xbf16>
    %80 = vector.extract_strided_slice %11 {offsets = [24, 0], sizes = [8, 16], strides = [1, 1]} : vector<32x16xbf16> to vector<8x16xbf16>
    %81 = vector.extract_strided_slice %13 {offsets = [0, 24], sizes = [16, 8], strides = [1, 1]} : vector<16x32xbf16> to vector<16x8xbf16>
    %cst_27 = arith.constant dense<0.000000e+00> : vector<16x16xf32>
    %82 = tpu.matmul %79, %80, %cst_27 {dimension_numbers = #tpu.dot_dimension_numbers<[1], [0], [0], [1], [0, 0, 1, 1], [], []>} : vector<16x8xbf16>, vector<8x16xbf16>, vector<16x16xf32> -> vector<16x16xf32>
    %83 = arith.addf %82, %14 : vector<16x16xf32>
    %cst_28 = arith.constant dense<0xFF800000> : vector<16xf32>
    %84 = vector.multi_reduction <maximumf>, %83, %cst_28 [1] : vector<16x16xf32> to vector<16xf32>
    %85 = vector.shape_cast %84 : vector<16xf32> to vector<16x1xf32>
    %86 = vector.broadcast %85 : vector<16x1xf32> to vector<16x16xf32>
    %87 = arith.subf %83, %86 : vector<16x16xf32>
    %88 = math.exp %87 : vector<16x16xf32>
    %cst_29 = arith.constant dense<0.000000e+00> : vector<16xf32>
    %89 = vector.multi_reduction <add>, %88, %cst_29 [1] : vector<16x16xf32> to vector<16xf32>
    %90 = vector.shape_cast %89 : vector<16xf32> to vector<16x1xf32>
    %91 = tpu.reciprocal %90 {approx = true} : vector<16x1xf32> -> vector<16x1xf32>
    %92 = arith.truncf %88 : vector<16x16xf32> to vector<16x16xbf16>
    %cst_30 = arith.constant dense<0.000000e+00> : vector<16x8xf32>
    %93 = tpu.matmul %92, %81, %cst_30 {dimension_numbers = #tpu.dot_dimension_numbers<[1], [0], [0], [1], [0, 0, 1, 1], [], []>} : vector<16x16xbf16>, vector<16x8xbf16>, vector<16x8xf32> -> vector<16x8xf32>
    %94 = vector.broadcast %91 : vector<16x1xf32> to vector<16x8xf32>
    %95 = arith.mulf %93, %94 : vector<16x8xf32>
    %96 = arith.truncf %95 : vector<16x8xf32> to vector<16x8xbf16>
    %c24 = arith.constant 24 : index
    %c0_31 = arith.constant 0 : index
    %97 = vector.load %arg4[%c24, %c0_31] : memref<32x32xbf16, #tpu.memory_space<vmem>>, vector<8x32xbf16>
    %cst_32 = arith.constant dense<0.000000e+00> : vector<16x32xf32>
    %98 = tpu.matmul %96, %97, %cst_32 {dimension_numbers = #tpu.dot_dimension_numbers<[1], [0], [0], [1], [0, 0, 1, 1], [], []>} : vector<16x8xbf16>, vector<8x32xbf16>, vector<16x32xf32> -> vector<16x32xf32>
    %99 = arith.addf %78, %98 : vector<16x32xf32>
    %c0_33 = arith.constant 0 : index
    %c0_34 = arith.constant 0 : index
    %100 = vector.load %arg5[%c0_33, %c0_34] : memref<1x32xf32, #tpu.memory_space<vmem>>, vector<1x32xf32>
    %101 = vector.broadcast %100 : vector<1x32xf32> to vector<16x32xf32>
    %102 = arith.addf %99, %101 : vector<16x32xf32>
    %103 = arith.addf %102, %0 : vector<16x32xf32>
    %c0_35 = arith.constant 0 : index
    %c0_36 = arith.constant 0 : index
    %104 = vector.load %arg6[%c0_35, %c0_36] : memref<1x32xf32, #tpu.memory_space<vmem>>, vector<1x32xf32>
    %c0_37 = arith.constant 0 : index
    %c0_38 = arith.constant 0 : index
    %105 = vector.load %arg7[%c0_37, %c0_38] : memref<1x32xf32, #tpu.memory_space<vmem>>, vector<1x32xf32>
    %cst_39 = arith.constant dense<0.000000e+00> : vector<16xf32>
    %106 = vector.multi_reduction <add>, %103, %cst_39 [1] : vector<16x32xf32> to vector<16xf32>
    %107 = vector.shape_cast %106 : vector<16xf32> to vector<16x1xf32>
    %cst_40 = arith.constant 3.200000e+01 : f32
    %108 = vector.broadcast %cst_40 : f32 to vector<16x1xf32>
    %109 = arith.divf %107, %108 : vector<16x1xf32>
    %110 = vector.broadcast %109 : vector<16x1xf32> to vector<16x32xf32>
    %111 = arith.subf %103, %110 : vector<16x32xf32>
    %112 = arith.mulf %111, %111 : vector<16x32xf32>
    %cst_41 = arith.constant dense<0.000000e+00> : vector<16xf32>
    %113 = vector.multi_reduction <add>, %112, %cst_41 [1] : vector<16x32xf32> to vector<16xf32>
    %114 = vector.shape_cast %113 : vector<16xf32> to vector<16x1xf32>
    %cst_42 = arith.constant 3.200000e+01 : f32
    %115 = vector.broadcast %cst_42 : f32 to vector<16x1xf32>
    %116 = arith.divf %114, %115 : vector<16x1xf32>
    %117 = vector.broadcast %109 : vector<16x1xf32> to vector<16x32xf32>
    %118 = arith.subf %103, %117 : vector<16x32xf32>
    %cst_43 = arith.constant 9.99999974E-6 : f32
    %119 = vector.broadcast %cst_43 : f32 to vector<16x1xf32>
    %120 = arith.addf %116, %119 : vector<16x1xf32>
    %121 = math.rsqrt %120 : vector<16x1xf32>
    %122 = vector.broadcast %121 : vector<16x1xf32> to vector<16x32xf32>
    %123 = arith.mulf %118, %122 : vector<16x32xf32>
    %124 = vector.broadcast %104 : vector<1x32xf32> to vector<16x32xf32>
    %125 = arith.mulf %123, %124 : vector<16x32xf32>
    %126 = vector.broadcast %105 : vector<1x32xf32> to vector<16x32xf32>
    %127 = arith.addf %125, %126 : vector<16x32xf32>
    %128 = arith.truncf %127 : vector<16x32xf32> to vector<16x32xbf16>
    %c0_44 = arith.constant 0 : index
    %c0_45 = arith.constant 0 : index
    %129 = vector.load %arg8[%c0_44, %c0_45] : memref<32x128xbf16, #tpu.memory_space<vmem>>, vector<32x128xbf16>
    %cst_46 = arith.constant dense<0.000000e+00> : vector<16x128xf32>
    %130 = tpu.matmul %128, %129, %cst_46 {dimension_numbers = #tpu.dot_dimension_numbers<[1], [0], [0], [1], [0, 0, 1, 1], [], []>} : vector<16x32xbf16>, vector<32x128xbf16>, vector<16x128xf32> -> vector<16x128xf32>
    %c0_47 = arith.constant 0 : index
    %c0_48 = arith.constant 0 : index
    %131 = vector.load %arg9[%c0_47, %c0_48] : memref<1x128xf32, #tpu.memory_space<vmem>>, vector<1x128xf32>
    %132 = vector.broadcast %131 : vector<1x128xf32> to vector<16x128xf32>
    %133 = arith.addf %130, %132 : vector<16x128xf32>
    %cst_49 = arith.constant 0.000000e+00 : f32
    %134 = vector.broadcast %cst_49 : f32 to vector<16x128xf32>
    %135 = arith.maximumf %133, %134 : vector<16x128xf32>
    %136 = arith.truncf %135 : vector<16x128xf32> to vector<16x128xbf16>
    %c0_50 = arith.constant 0 : index
    %c0_51 = arith.constant 0 : index
    %137 = vector.load %arg10[%c0_50, %c0_51] : memref<128x32xbf16, #tpu.memory_space<vmem>>, vector<128x32xbf16>
    %cst_52 = arith.constant dense<0.000000e+00> : vector<16x32xf32>
    %138 = tpu.matmul %136, %137, %cst_52 {dimension_numbers = #tpu.dot_dimension_numbers<[1], [0], [0], [1], [0, 0, 1, 1], [], []>} : vector<16x128xbf16>, vector<128x32xbf16>, vector<16x32xf32> -> vector<16x32xf32>
    %c0_53 = arith.constant 0 : index
    %c0_54 = arith.constant 0 : index
    %139 = vector.load %arg11[%c0_53, %c0_54] : memref<1x32xf32, #tpu.memory_space<vmem>>, vector<1x32xf32>
    %140 = vector.broadcast %139 : vector<1x32xf32> to vector<16x32xf32>
    %141 = arith.addf %138, %140 : vector<16x32xf32>
    %142 = arith.addf %141, %127 : vector<16x32xf32>
    %c0_55 = arith.constant 0 : index
    %c0_56 = arith.constant 0 : index
    %143 = vector.load %arg12[%c0_55, %c0_56] : memref<1x32xf32, #tpu.memory_space<vmem>>, vector<1x32xf32>
    %c0_57 = arith.constant 0 : index
    %c0_58 = arith.constant 0 : index
    %144 = vector.load %arg13[%c0_57, %c0_58] : memref<1x32xf32, #tpu.memory_space<vmem>>, vector<1x32xf32>
    %cst_59 = arith.constant dense<0.000000e+00> : vector<16xf32>
    %145 = vector.multi_reduction <add>, %142, %cst_59 [1] : vector<16x32xf32> to vector<16xf32>
    %146 = vector.shape_cast %145 : vector<16xf32> to vector<16x1xf32>
    %cst_60 = arith.constant 3.200000e+01 : f32
    %147 = vector.broadcast %cst_60 : f32 to vector<16x1xf32>
    %148 = arith.divf %146, %147 : vector<16x1xf32>
    %149 = vector.broadcast %148 : vector<16x1xf32> to vector<16x32xf32>
    %150 = arith.subf %142, %149 : vector<16x32xf32>
    %151 = arith.mulf %150, %150 : vector<16x32xf32>
    %cst_61 = arith.constant dense<0.000000e+00> : vector<16xf32>
    %152 = vector.multi_reduction <add>, %151, %cst_61 [1] : vector<16x32xf32> to vector<16xf32>
    %153 = vector.shape_cast %152 : vector<16xf32> to vector<16x1xf32>
    %cst_62 = arith.constant 3.200000e+01 : f32
    %154 = vector.broadcast %cst_62 : f32 to vector<16x1xf32>
    %155 = arith.divf %153, %154 : vector<16x1xf32>
    %156 = vector.broadcast %148 : vector<16x1xf32> to vector<16x32xf32>
    %157 = arith.subf %142, %156 : vector<16x32xf32>
    %cst_63 = arith.constant 9.99999974E-6 : f32
    %158 = vector.broadcast %cst_63 : f32 to vector<16x1xf32>
    %159 = arith.addf %155, %158 : vector<16x1xf32>
    %160 = math.rsqrt %159 : vector<16x1xf32>
    %161 = vector.broadcast %160 : vector<16x1xf32> to vector<16x32xf32>
    %162 = arith.mulf %157, %161 : vector<16x32xf32>
    %163 = vector.broadcast %143 : vector<1x32xf32> to vector<16x32xf32>
    %164 = arith.mulf %162, %163 : vector<16x32xf32>
    %165 = vector.broadcast %144 : vector<1x32xf32> to vector<16x32xf32>
    %166 = arith.addf %164, %165 : vector<16x32xf32>
    %c0_64 = arith.constant 0 : index
    %c0_65 = arith.constant 0 : index
    %167 = vector.load %arg14[%c0_64, %c0_65] : memref<16x32xf32, #tpu.memory_space<vmem>>, vector<16x32xf32>
    tpu.vector_store %arg14[%c0_64, %c0_65], %166 {strides = array<i32>} : memref<16x32xf32, #tpu.memory_space<vmem>>, vector<16x32xf32>,
    return
  }
}

</mosaic_0001>

<bundles_post_ra>
// kernel: eq.8
= control target key start
LH: loop header
LB: loop body
LE: loop exit
PB: predicated region body
PF: predicated region fallthrough
CT: control target
= control target key end

     0   :  { %vm7_vm0 = vcmask 64512   ;;  %vm13_vm1 = vcmask 130112   ;;  %s39_s0 = inlined_call_operand.vmem [shape: s32[2,8], index: 0, kind: input, shape index: {}]   ;;  %s40_s1 = inlined_call_operand.vmem [shape: s32[16], index: 1, kind: output, shape index: {}]  }
   0x1   :  { %v4_v0 = vld [vmem:[%s39_s0] sm:$0x3]  ;;  %s22_s0 = smov 8  }
   0x2   :  { %5 = vst [vmem:[#allocation1] sm:$0x3] %v4_v0 }
   0x9   :  { %v10_v1 = vld [vmem:[#allocation1 + $0x1] sm:$0x1]   ;;  %v6_v2 = vld [vmem:[#allocation1] sm:$0x1]  }
   0xa   :  { %11 = vrot.lane.b32.xlu0 %v10_v1, %s22_s0  ;;  %8 = vst.msk [vmem:[#allocation0] sm:$0x1] %vm7_vm0, %v6_v2  }
  0x7c   :  { %v12_v3 = vpop.permute.xlu0 %11  }
  0x7d   :  { %14 = vst.msk [vmem:[#allocation0] sm:$0x1] %vm13_vm1, %v12_v3  }
  0x84   :  { %v18_v4 = vld [vmem:[#allocation0] sm:$0x1] }
  0x85   :  { %20 = vst [vmem:[%s40_s1] sm:$0x1] %v18_v4 }

// kernel: bert_block.1
= control target key start
LH: loop header
LB: loop body
LE: loop exit
PB: predicated region body
PF: predicated region fallthrough
CT: control target
= control target key end

     0   :  { %v1420_v1 = vmov 0.0   ;;  %vm1421_vm0 = vmmov 0   ;;  %vm75_vm1 = vcmask 261120   ;;  %s1748_s0 = inlined_call_operand.vmem [shape: f32[16,32], index: 0, kind: input, shape index: {}]   ;;  %s1749_s1 = inlined_call_operand.vmem [shape: f32[16,16], index: 1, kind: input, shape index: {}]   ;;  %s1750_s2 = inlined_call_operand.vmem [shape: bf16[32,96], index: 2, kind: input, shape index: {}]   ;;  %s1751_s3 = inlined_call_operand.vmem [shape: f32[1,96], index: 3, kind: input, shape index: {}]   ;;  %s1752_s4 = inlined_call_operand.vmem [shape: bf16[32,32], index: 4, kind: input, shape index: {}]   ;;  %s1753_s5 = inlined_call_operand.vmem [shape: f32[1,32], index: 5, kind: input, shape index: {}]   ;;  %s1754_s6 = inlined_call_operand.vmem [shape: f32[1,32], index: 6, kind: input, shape index: {}]   ;;  %s1755_s7 = inlined_call_operand.vmem [shape: f32[1,32], index: 7, kind: input, shape index: {}]   ;;  %s1756_s8 = inlined_call_operand.vmem [shape: bf16[32,128], index: 8, kind: input, shape index: {}]   ;;  %s1757_s9 = inlined_call_operand.vmem [shape: f32[1,128], index: 9, kind: input, shape index: {}]   ;;  %s1758_s10 = inlined_call_operand.vmem [shape: bf16[128,32], index: 10, kind: input, shape index: {}]   ;;  %s1759_s11 = inlined_call_operand.vmem [shape: f32[1,32], index: 11, kind: input, shape index: {}]   ;;  %s1760_s12 = inlined_call_operand.vmem [shape: f32[1,32], index: 12, kind: input, shape index: {}]   ;;  %s1761_s13 = inlined_call_operand.vmem [shape: f32[1,32], index: 13, kind: input, shape index: {}]   ;;  %s1762_s14 = inlined_call_operand.hbm [shape: f32[16,32], index: 14, kind: output, shape index: {}]  }
   0x1   :  { %v1344_v0 = vld [vmem:[%s1750_s2] sm:$0xff]   ;;  %1223 = vmatprep.subr.bf16.mxu0 %v1420_v1  ;;  %1249 = vmatprep.subr.bf16.mxu1 %v1420_v1  ;;  %v1345_v2 = vld [vmem:[%s1750_s2 + $0x8] sm:$0xff]  }
   0x2   :  { %1224 = vmatpush3.bf16.msra.mxu0 %v1344_v0  ;;  %1227 = vmatprep.mubr.msk.bf16.mxu0 %vm1421_vm0, %v1420_v1  ;;  %v1521_v3 = vld [vmem:[%s1748_s0] sm:$0xff]  ;;  %v1526_v4 = vld [vmem:[%s1748_s0 + $0x8] sm:$0xff] }
   0x3   :  { %1225 = vmatprep.subr.bf16.mxu0 %v1420_v1  ;;  %1251 = vmatprep.mubr.msk.bf16.mxu1 %vm1421_vm0, %v1420_v1  ;;  %v51_v5 = vpack.c.bf16 %v1526_v4, %v1521_v3 }
   0x6   :  { %1226 = vmatpush3.bf16.msra.mxu0 %v1345_v2 }
   0x7   :  { %1231 = vmatprep.subr.bf16.mxu0 %v1420_v1 }
   0x9   :  { %1228 = vmatmul.mubr.msk.bf16.vlgmr.msra.gmra.mrb[0].mxu0 %vm75_vm1, %v51_v5 }
   0xa   :  { %19 = vsyncpa [#allocation3], 0  ;;  %1233 = vmatprep.mubr.msk.bf16.mxu0 %vm1421_vm0, %v1420_v1  ;;  %v1150_v6 = vld [vmem:[%s1751_s3] ss:$0 sm:$0xff]  ;;  %s1422_s21 = smov 96   ;;  %vm169_vm2 = vcmask 1043456  }
   0xb   :  { %vm165_vm3 = vcmask 64512   ;;  %v1551_v20 = vld [vmem:[%s1749_s1] sm:$0xff]  ;;  %v1556_v22 = vld [vmem:[%s1749_s1 + $0x8] sm:$0xff]  ;;  %vm214_vm4 = vcmask 130048   ;;  %s1423_s25 = smov 120   ;;  %s1424_s26 = smov 64  }
   0xc   :  { %s1425_s1 = smov 56   ;;  %s1426_s27 = smov 112  }
   0xd   :  { %s1427_s16 = smov 48   ;;  %s1428_s17 = smov 104  }
   0xe   :  { %s1429_s20 = smov 40   ;;  %s1430_s24 = smov [#allocation2]  }
  0xdc   :  { %v113_v7 = vpop.f32.mrb[0].mxu0 }
  0xdd   :  { %v114_v8 = vadd.f32 %v1150_v6, %v113_v7  ;;  %v1229_v9 = vpop.f32.mrb[1].mxu0 }
  0xde   :  { %v116_v10 = vpop.f32.mrb[2].mxu0 }
  0xdf   :  { %v117_v11 = vadd.f32 %v1150_v6, %v116_v10  ;;  %123 = vrot.lane.b32.xlu0 %v114_v8, %s1422_s21  ;;  %v1230_v12 = vpop.f32.mrb[3].mxu0  ;;  %v287_v10 = vld [vmem:[%s1752_s4] sm:$0xf] }
  0xe0   :  { %v410_v12 = vld [vmem:[%s1752_s4 + $0x4] sm:$0xf] }
  0xe1   :  { %v1540_v13 = vpack.c.bf16 %v117_v11, %v114_v8 }
  0xe3   :  { %125 = vrot.lane.b32.xlu0 %v117_v11, %s1422_s21  ;;  %v462_v11 = vsel %vm169_vm2, %v287_v10, 0  ;;  %v625_v10 = vld [vmem:[%s1752_s4 + $0x8] sm:$0xf] }
 0x151   :  { %v124_v14 = vpop.permute.xlu0 %123 }
 0x152   :  { %129 = vxpose.xlu1.b32.start [1/2] (short) (narrow) %v124_v14, 32  ;;  %v415_v14 = vsel %vm169_vm2, %v410_v12, 0 }
 0x155   :  { %v126_v15 = vpop.permute.xlu0 %125 }
 0x156   :  { %130 = vxpose.xlu1.b32.end [2/2] (short) (narrow) %v126_v15, 32 }
 0x1d2   :  { %v145_v16 = vpop.trf.xlu1 }
 0x1d6   :  { %v146_v17 = vpop.trf.xlu1 }
 0x1d7   :  { %v161_v18 = vpack.c.bf16 %v146_v17, %v145_v16 }
 0x1d9   :  { %v171_v19 = vsel %vm169_vm2, %v161_v18, 0  ;;  %v291_v40 = vrot.slane %v161_v18, 4 }
 0x1da   :  { %1232 = vmatpush3.bf16.msra.mxu0 %v171_v19  ;;  %v1564_v30 = vpop.trf.xlu1 }
 0x1db   :  { %1237 = vmatprep.subr.bf16.mxu0 %v1420_v1  ;;  %v296_v43 = vsel %vm169_vm2, %v291_v40, 0 }
 0x1dd   :  { %1234 = vmatmul.mubr.msk.bf16.vlgmr.msra.gmra.mrb[4].mxu0 %vm165_vm3, %v1540_v13 }
 0x1de   :  { %1239 = vmatprep.mubr.msk.bf16.mxu0 %vm1421_vm0, %v1420_v1  ;;  %v1566_v31 = vpop.trf.xlu1 }
 0x2b0   :  { %v207_v21 = vpop.f32.mrb[4].mxu0 }
 0x2b1   :  { %v208_v23 = vadd.f32 %v207_v21, %v1551_v20  ;;  %v1235_v24 = vpop.f32.mrb[5].mxu0 }
 0x2b2   :  { %v210_v25 = vpop.f32.mrb[6].mxu0 }
 0x2b3   :  { %v211_v26 = vadd.f32 %v210_v25, %v1556_v22  ;;  %v1236_v27 = vpop.f32.mrb[7].mxu0  ;;  %v215_v28 = vsel %vm214_vm4, %v208_v23, -inf }
 0x2b4   :  { %216 = vmax.xlane.f32.xlu0 %v215_v28 }
 0x2b5   :  { %v218_v29 = vsel %vm214_vm4, %v211_v26, -inf }
 0x2b6   :  { %219 = vmax.xlane.f32.xlu1 %v218_v29 }
 0x2c7   :  { %288 = vrot.lane.b32.xlu1 %v1540_v13, %s1423_s25  ;;  %s1139_s25 = sshll.u32 %s1430_s24, 4  ;;  %s1140_s25 = int_to_ptr.vmem [resolvable:$true] %s1139_s25 }
 0x2c8   :  { %p1401_p1 = scmp.lt.s32.totalorder %s1140_s25, %s1140_s25 }
 0x2ca   :  { %237 = vrot.lane.b32.xlu0 %v1540_v13, %s1424_s26  ;;  %s1396_s26 = scalar_lea.vmem %s1140_s25, 256 }
 0x2cb   :  { %p1397_p0 = scmp.ne.s32.totalorder %s1140_s25, %s1396_s26  ;;  %p1402_p2 = scmp.lt.s32.totalorder %s1396_s26, %s1396_s26 }
 0x2cd   :  { %p1403_p3 = por %p1402_p2, %p1401_p1 }
 0x2cf   :  { %p1404_p4 = pnand %p1403_p3, %p1397_p0 }
 0x341   :  { %v217_v32 = vpop.xlane.xlu0 %216 }
 0x342   :  { %v221_v33 = vsub.f32 %v208_v23, %v217_v32 }
 0x343   :  { %v220_v34 = vpop.xlane.xlu1 %219 }
 0x344   :  { %v223_v35 = vmul.f32 1.442695, %v221_v33  ;;  %v222_v36 = vsub.f32 %v211_v26, %v220_v34 }
 0x345   :  { %v238_v37 = vpop.permute.xlu0 %237 }
 0x346   :  { %v225_v38 = vmul.f32 1.442695, %v222_v36  ;;  %1238 = vmatpush3.bf16.msra.mxu0 %v238_v37  ;;  %1356 = vpow2.f32 %v223_v35  ;;  %v162_v35 = vpack.c.bf16 %v1566_v31, %v1564_v30 }
 0x347   :  { %1243 = vmatprep.subr.bf16.mxu0 %v1420_v1  ;;  %v289_v44 = vpop.permute.xlu1 %288 }
 0x348   :  { %1358 = vpow2.f32 %v225_v38 }
 0x350   :  { %v1357_v39 = vpop.eup %1356 }
 0x351   :  { %v227_v9 = vsel %vm214_vm4, %v1357_v39, 0.0 }
 0x352   :  { %v1359_v41 = vpop.eup %1358 }
 0x353   :  { %v235_v42 = vpack.c.bf16 %v1359_v41, %v1357_v39  ;;  %v230_v57 = vsel %vm214_vm4, %v1359_v41, 0.0  ;;  %v511_v39 = vsel %vm169_vm2, %v162_v35, 0 }
 0x355   :  { %1240 = vmatmul.mubr.msk.bf16.vlgmr.msra.gmra.mrb[8].mxu0 %vm214_vm4, %v235_v42 }
 0x356   :  { %1244 = vmatpush3.bf16.msra.mxu0 %v296_v43  ;;  %1245 = vmatprep.mubr.msk.bf16.mxu0 %vm1421_vm0, %v1420_v1 }
 0x357   :  { %1255 = vmatprep.subr.bf16.mxu0 %v1420_v1 }
 0x35d   :  { %1246 = vmatmul.mubr.msk.bf16.vlgmr.msra.gmra.mrb[12].mxu0 %vm165_vm3, %v289_v44 }
 0x35e   :  { %1257 = vmatprep.mubr.msk.bf16.mxu0 %vm1421_vm0, %v1420_v1  ;;  %1256 = vmatpush3.bf16.msra.mxu0 %v415_v14 }
 0x35f   :  { %1267 = vmatprep.subr.bf16.mxu0 %v1420_v1 }
 0x428   :  { %v277_v45 = vpop.f32.mrb[8].mxu0 }
 0x429   :  { %v1241_v46 = vpop.f32.mrb[9].mxu0 }
 0x42a   :  { %v280_v47 = vpop.f32.mrb[10].mxu0 }
 0x42b   :  { %v1242_v48 = vpop.f32.mrb[11].mxu0 }
 0x430   :  { %v332_v49 = vpop.f32.mrb[12].mxu0 }
 0x431   :  { %v333_v50 = vadd.f32 %v332_v49, %v1551_v20  ;;  %v1247_v51 = vpop.f32.mrb[13].mxu0 }
 0x432   :  { %v335_v52 = vpop.f32.mrb[14].mxu0 }
 0x433   :  { %v336_v53 = vadd.f32 %v335_v52, %v1556_v22  ;;  %v1248_v54 = vpop.f32.mrb[15].mxu0  ;;  %v339_v55 = vsel %vm214_vm4, %v333_v50, -inf }
 0x434   :  { %340 = vmax.xlane.f32.xlu0 %v339_v55 }
 0x435   :  { %v342_v56 = vsel %vm214_vm4, %v336_v53, -inf }
 0x436   :  { %343 = vmax.xlane.f32.xlu1 %v342_v56 }
 0x44a   :  { %360 = vrot.lane.b32.xlu0 %v1540_v13, %s1425_s1 }
 0x44e   :  { %505 = vrot.lane.b32.xlu0 %v1540_v13, %s1426_s27 }
 0x46d   :  { %231 = vadd.xlane.f32.xlu0 %v230_v57 }
 0x4c1   :  { %v341_v58 = vpop.xlane.xlu0 %340 }
 0x4c2   :  { %v345_v59 = vsub.f32 %v333_v50, %v341_v58 }
 0x4c3   :  { %v344_v60 = vpop.xlane.xlu1 %343 }
 0x4c4   :  { %v347_v61 = vmul.f32 1.442695, %v345_v59  ;;  %v346_v62 = vsub.f32 %v336_v53, %v344_v60 }
 0x4c5   :  { %v361_v63 = vpop.permute.xlu0 %360 }
 0x4c6   :  { %1360 = vpow2.f32 %v347_v61  ;;  %v349_v0 = vmul.f32 1.442695, %v346_v62  ;;  %1250 = vmatpush3.bf16.msra.mxu1 %v361_v63 }
 0x4c7   :  { %1261 = vmatprep.subr.bf16.mxu1 %v1420_v1 }
 0x4c8   :  { %1362 = vpow2.f32 %v349_v0 }
 0x4c9   :  { %v506_v15 = vpop.permute.xlu0 %505 }
 0x4d0   :  { %v1361_v2 = vpop.eup %1360 }
 0x4d1   :  { %v351_v5 = vsel %vm214_vm4, %v1361_v2, 0.0 }
 0x4d2   :  { %v1363_v6 = vpop.eup %1362  ;;  %352 = vadd.xlane.f32.xlu1 %v351_v5 }
 0x4d3   :  { %v359_v7 = vpack.c.bf16 %v1363_v6, %v1361_v2  ;;  %v354_v8 = vsel %vm214_vm4, %v1363_v6, 0.0  ;;  %v678_v2 = vrot.slane %v162_v35, 4 }
 0x4d5   :  { %1252 = vmatmul.mubr.msk.bf16.vlgmr.msra.gmra.mrb[0].mxu1 %vm214_vm4, %v359_v7 }
 0x4d6   :  { %355 = vadd.xlane.f32.xlu1 %v354_v8  ;;  %1263 = vmatprep.mubr.msk.bf16.mxu1 %vm1421_vm0, %v1420_v1  ;;  %v683_v8 = vsel %vm169_vm2, %v678_v2, 0 }
 0x4d7   :  { %1262 = vmatpush3.bf16.msra.mxu1 %v462_v11  ;;  %v630_v11 = vsel %vm169_vm2, %v625_v10, 0 }
 0x4d8   :  { %1273 = vmatprep.subr.bf16.mxu1 %v1420_v1 }
 0x4da   :  { %228 = vadd.xlane.f32.xlu1 %v227_v9 }
 0x4fa   :  { %v232_v17 = vpop.xlane.xlu0 %231 }
 0x4fb   :  { %1364 = vrcp.f32 %v232_v17 }
 0x505   :  { %v1365_v21 = vpop.eup %1364 }
 0x506   :  { %v285_v24 = vmul.f32 %v1365_v21, %v280_v47 }
 0x55f   :  { %v353_v16 = vpop.xlane.xlu1 %352 }
 0x563   :  { %v356_v18 = vpop.xlane.xlu1 %355 }
 0x567   :  { %v229_v19 = vpop.xlane.xlu1 %228 }
 0x568   :  { %1366 = vrcp.f32 %v229_v19 }
 0x569   :  { %1368 = vrcp.f32 %v353_v16 }
 0x56a   :  { %1370 = vrcp.f32 %v356_v18 }
 0x572   :  { %v1367_v23 = vpop.eup %1366 }
 0x573   :  { %v284_v25 = vmul.f32 %v1367_v23, %v277_v45  ;;  %v1369_v27 = vpop.eup %1368 }
 0x574   :  { %v1371_v33 = vpop.eup %1370 }
 0x575   :  { %v286_v26 = vpack.c.bf16 %v285_v24, %v284_v25 }
 0x577   :  { %1264 = vmatmul.mubr.msk.bf16.vlgmr.msra.gmra.mrb[4].mxu1 %vm165_vm3, %v286_v26 }
 0x578   :  { %1275 = vmatprep.mubr.msk.bf16.mxu1 %vm1421_vm0, %v1420_v1 }
 0x5a8   :  { %v400_v28 = vpop.f32.mrb[0].mxu1 }
 0x5a9   :  { %v407_v29 = vmul.f32 %v1369_v27, %v400_v28  ;;  %v1253_v32 = vpop.f32.mrb[1].mxu1 }
 0x5aa   :  { %v403_v34 = vpop.f32.mrb[2].mxu1 }
 0x5ab   :  { %v408_v36 = vmul.f32 %v1371_v33, %v403_v34  ;;  %v1254_v37 = vpop.f32.mrb[3].mxu1 }
 0x5ad   :  { %v409_v38 = vpack.c.bf16 %v408_v36, %v407_v29 }
 0x5af   :  { %1258 = vmatmul.mubr.msk.bf16.vlgmr.msra.gmra.mrb[16].mxu0 %vm165_vm3, %v409_v38 }
 0x5b0   :  { %1268 = vmatpush3.bf16.msra.mxu0 %v511_v39  ;;  %1269 = vmatprep.mubr.msk.bf16.mxu0 %vm1421_vm0, %v1420_v1 }
 0x5b1   :  { %1279 = vmatprep.subr.bf16.mxu0 %v1420_v1 }
 0x5b7   :  { %1270 = vmatmul.mubr.msk.bf16.vlgmr.msra.gmra.mrb[20].mxu0 %vm165_vm3, %v506_v15 }
 0x5b8   :  { %1281 = vmatprep.mubr.msk.bf16.mxu0 %vm1421_vm0, %v1420_v1  ;;  %1280 = vmatpush3.bf16.msra.mxu0 %v630_v11 }
 0x5b9   :  { %1291 = vmatprep.subr.bf16.mxu0 %v1420_v1 }
 0x64a   :  { %v498_v40 = vpop.f32.mrb[4].mxu1 }
 0x64b   :  { %v1265_v30 = vpop.f32.mrb[5].mxu1 }
 0x64c   :  { %v501_v31 = vpop.f32.mrb[6].mxu1 }
 0x64d   :  { %v1266_v41 = vpop.f32.mrb[7].mxu1 }
 0x682   :  { %v451_v42 = vpop.f32.mrb[16].mxu0 }
 0x683   :  { %v1614_v43 = vadd.f32 %v498_v40, %v451_v42  ;;  %v1259_v44 = vpop.f32.mrb[17].mxu0 }
 0x684   :  { %v454_v45 = vpop.f32.mrb[18].mxu0 }
 0x685   :  { %v1616_v46 = vadd.f32 %v501_v31, %v454_v45  ;;  %v1260_v47 = vpop.f32.mrb[19].mxu0 }
 0x68a   :  { %v547_v48 = vpop.f32.mrb[20].mxu0 }
 0x68b   :  { %v548_v49 = vadd.f32 %v547_v48, %v1551_v20  ;;  %v1271_v50 = vpop.f32.mrb[21].mxu0 }
 0x68c   :  { %v550_v51 = vpop.f32.mrb[22].mxu0 }
 0x68d   :  { %v551_v52 = vadd.f32 %v550_v51, %v1556_v22  ;;  %v1272_v53 = vpop.f32.mrb[23].mxu0  ;;  %v554_v54 = vsel %vm214_vm4, %v548_v49, -inf  ;;  %v797_v51 = vld [vmem:[%s1752_s4 + $0xc] sm:$0xf] }
 0x68e   :  { %555 = vmax.xlane.f32.xlu1 %v554_v54 }
 0x68f   :  { %v557_v55 = vsel %vm214_vm4, %v551_v52, -inf }
 0x692   :  { %558 = vmax.xlane.f32.xlu1 %v557_v55 }
 0x6a3   :  { %575 = vrot.lane.b32.xlu1 %v1540_v13, %s1427_s16 }
 0x6a7   :  { %675 = vrot.lane.b32.xlu1 %v1540_v13, %s1428_s17 }
 0x71b   :  { %v556_v56 = vpop.xlane.xlu1 %555 }
 0x71c   :  { %v560_v57 = vsub.f32 %v548_v49, %v556_v56 }
 0x71e   :  { %v562_v58 = vmul.f32 1.442695, %v560_v57 }
 0x71f   :  { %v559_v59 = vpop.xlane.xlu1 %558 }
 0x720   :  { %1372 = vpow2.f32 %v562_v58  ;;  %v561_v60 = vsub.f32 %v551_v52, %v559_v59  ;;  %v802_v52 = vsel %vm169_vm2, %v797_v51, 0  ;;  %v1169_v51 = vld [vmem:[%s1757_s9] ss:$0 sm:$0xff] }
 0x722   :  { %v564_v61 = vmul.f32 1.442695, %v561_v60 }
 0x723   :  { %v576_v62 = vpop.permute.xlu1 %575 }
 0x724   :  { %1374 = vpow2.f32 %v564_v61  ;;  %1274 = vmatpush3.bf16.msra.mxu1 %v576_v62 }
 0x725   :  { %1285 = vmatprep.subr.bf16.mxu1 %v1420_v1 }
 0x727   :  { %v676_v9 = vpop.permute.xlu1 %675 }
 0x72a   :  { %v1373_v63 = vpop.eup %1372 }
 0x72b   :  { %v566_v0 = vsel %vm214_vm4, %v1373_v63, 0.0 }
 0x72c   :  { %567 = vadd.xlane.f32.xlu0 %v566_v0 }
 0x72e   :  { %v1375_v5 = vpop.eup %1374 }
 0x72f   :  { %v569_v6 = vsel %vm214_vm4, %v1375_v5, 0.0  ;;  %v574_v7 = vpack.c.bf16 %v1375_v5, %v1373_v63  ;;  %v1166_v63 = vld [vmem:[%s1753_s5] ss:$0 sm:$0xff] }
 0x730   :  { %570 = vadd.xlane.f32.xlu1 %v569_v6 }
 0x731   :  { %1276 = vmatmul.mubr.msk.bf16.vlgmr.msra.gmra.mrb[8].mxu1 %vm214_vm4, %v574_v7 }
 0x732   :  { %1286 = vmatpush3.bf16.msra.mxu1 %v683_v8  ;;  %1287 = vmatprep.mubr.msk.bf16.mxu1 %vm1421_vm0, %v1420_v1 }
 0x733   :  { %1297 = vmatprep.subr.bf16.mxu1 %v1420_v1 }
 0x739   :  { %1288 = vmatmul.mubr.msk.bf16.vlgmr.msra.gmra.mrb[12].mxu1 %vm165_vm3, %v676_v9 }
 0x73a   :  { %1299 = vmatprep.mubr.msk.bf16.mxu1 %vm1421_vm0, %v1420_v1  ;;  %1298 = vmatpush3.bf16.msra.mxu1 %v802_v52 }
 0x73b   :  { %1311 = vmatprep.subr.bf16.mxu1 %v1420_v1 }
 0x7b9   :  { %v568_v12 = vpop.xlane.xlu0 %567 }
 0x7ba   :  { %1376 = vrcp.f32 %v568_v12 }
 0x7bd   :  { %v571_v14 = vpop.xlane.xlu1 %570 }
 0x7be   :  { %1378 = vrcp.f32 %v571_v14 }
 0x7c4   :  { %v1377_v16 = vpop.eup %1376 }
 0x7c8   :  { %v1379_v18 = vpop.eup %1378 }
 0x804   :  { %v615_v15 = vpop.f32.mrb[8].mxu1 }
 0x805   :  { %v1277_v17 = vpop.f32.mrb[9].mxu1  ;;  %v622_v21 = vmul.f32 %v1377_v16, %v615_v15 }
 0x806   :  { %v618_v19 = vpop.f32.mrb[10].mxu1 }
 0x807   :  { %v623_v23 = vmul.f32 %v1379_v18, %v618_v19  ;;  %v1278_v24 = vpop.f32.mrb[11].mxu1 }
 0x809   :  { %v624_v25 = vpack.c.bf16 %v623_v23, %v622_v21 }
 0x80b   :  { %1282 = vmatmul.mubr.msk.bf16.vlgmr.msra.gmra.mrb[24].mxu0 %vm165_vm3, %v624_v25 }
 0x80c   :  { %v719_v26 = vpop.f32.mrb[12].mxu1  ;;  %1293 = vmatprep.mubr.msk.bf16.mxu0 %vm1421_vm0, %v1420_v1 }
 0x80d   :  { %v720_v27 = vadd.f32 %v719_v26, %v1551_v20  ;;  %v1289_v28 = vpop.f32.mrb[13].mxu1  ;;  %v1347_v26 = vld [vmem:[%s1756_s8 + $0x8] sm:$0xff]  }
 0x80e   :  { %v722_v29 = vpop.f32.mrb[14].mxu1  ;;  %v1349_v28 = vld [vmem:[%s1758_s10 + $0x8] sm:$0xff]  }
 0x80f   :  { %v723_v32 = vadd.f32 %v722_v29, %v1556_v22  ;;  %v1290_v33 = vpop.f32.mrb[15].mxu1  ;;  %v726_v34 = vsel %vm214_vm4, %v720_v27, -inf  ;;  %v1350_v29 = vld [vmem:[%s1758_s10 + $0x10] sm:$0xff]  }
 0x810   :  { %727 = vmax.xlane.f32.xlu0 %v726_v34  ;;  %v1352_v33 = vld [vmem:[%s1758_s10 + $0x20] sm:$0xff]   ;;  %v1353_v34 = vld [vmem:[%s1758_s10 + $0x28] sm:$0xff]  }
 0x811   :  { %v729_v35 = vsel %vm214_vm4, %v723_v32, -inf }
 0x814   :  { %730 = vmax.xlane.f32.xlu0 %v729_v35 }
 0x82a   :  { %747 = vrot.lane.b32.xlu0 %v1540_v13, %s1429_s20 }
 0x89d   :  { %v728_v36 = vpop.xlane.xlu0 %727 }
 0x89e   :  { %v732_v37 = vsub.f32 %v720_v27, %v728_v36  ;;  %v1348_v27 = vld [vmem:[%s1758_s10] sm:$0xff]  }
 0x8a0   :  { %v734_v38 = vmul.f32 1.442695, %v732_v37 }
 0x8a1   :  { %v731_v39 = vpop.xlane.xlu0 %730 }
 0x8a2   :  { %1380 = vpow2.f32 %v734_v38  ;;  %v733_v20 = vsub.f32 %v723_v32, %v731_v39  ;;  %v1351_v32 = vld [vmem:[%s1758_s10 + $0x18] sm:$0xff]  }
 0x8a4   :  { %v736_v40 = vmul.f32 1.442695, %v733_v20 }
 0x8a5   :  { %v748_v30 = vpop.permute.xlu0 %747 }
 0x8a6   :  { %1382 = vpow2.f32 %v736_v40  ;;  %1292 = vmatpush3.bf16.msra.mxu0 %v748_v30 }
 0x8a7   :  { %1303 = vmatprep.subr.bf16.mxu0 %v1420_v1 }
 0x8ac   :  { %v1381_v22 = vpop.eup %1380 }
 0x8ad   :  { %v738_v31 = vsel %vm214_vm4, %v1381_v22, 0.0 }
 0x8ae   :  { %739 = vadd.xlane.f32.xlu0 %v738_v31 }
 0x8b0   :  { %v1383_v41 = vpop.eup %1382 }
 0x8b1   :  { %v741_v42 = vsel %vm214_vm4, %v1383_v41, 0.0  ;;  %v746_v13 = vpack.c.bf16 %v1383_v41, %v1381_v22  ;;  %v1167_v22 = vld [vmem:[%s1754_s6] ss:$0 sm:$0xff] }
 0x8b2   :  { %742 = vadd.xlane.f32.xlu1 %v741_v42 }
 0x8b3   :  { %1294 = vmatmul.mubr.msk.bf16.vlgmr.msra.gmra.mrb[28].mxu0 %vm214_vm4, %v746_v13  ;;  %v1168_v13 = vld [vmem:[%s1755_s7] ss:$0 sm:$0xff] }
 0x8b4   :  { %1307 = vmatprep.mubr.msk.bf16.mxu0 %vm1421_vm0, %v1420_v1 }
 0x8de   :  { %v666_v44 = vpop.f32.mrb[24].mxu0 }
 0x8df   :  { %v673_v45 = vadd.f32 %v666_v44, %v1614_v43  ;;  %v1283_v47 = vpop.f32.mrb[25].mxu0 }
 0x8e0   :  { %v669_v48 = vpop.f32.mrb[26].mxu0 }
 0x8e1   :  { %v674_v49 = vadd.f32 %v669_v48, %v1616_v46  ;;  %v1284_v50 = vpop.f32.mrb[27].mxu0 }
 0x8e2   :  { %v1355_v50 = vld [vmem:[%s1758_s10 + $0x38] sm:$0xff]  }
 0x93b   :  { %v740_v53 = vpop.xlane.xlu0 %739 }
 0x93c   :  { %1384 = vrcp.f32 %v740_v53 }
 0x93f   :  { %v743_v54 = vpop.xlane.xlu1 %742 }
 0x940   :  { %1386 = vrcp.f32 %v743_v54 }
 0x946   :  { %v1385_v43 = vpop.eup %1384 }
 0x94a   :  { %v1387_v57 = vpop.eup %1386 }
 0x986   :  { %v787_v55 = vpop.f32.mrb[28].mxu0 }
 0x987   :  { %v1295_v56 = vpop.f32.mrb[29].mxu0  ;;  %v794_v46 = vmul.f32 %v1385_v43, %v787_v55 }
 0x988   :  { %v790_v58 = vpop.f32.mrb[30].mxu0 }
 0x989   :  { %v795_v59 = vmul.f32 %v1387_v57, %v790_v58  ;;  %v1296_v60 = vpop.f32.mrb[31].mxu0 }
 0x98b   :  { %v796_v61 = vpack.c.bf16 %v795_v59, %v794_v46 }
 0x98d   :  { %1300 = vmatmul.mubr.msk.bf16.vlgmr.msra.gmra.mrb[16].mxu1 %vm165_vm3, %v796_v61 }
 0x98e   :  { %1327 = vmatprep.mubr.msk.bf16.mxu1 %vm1421_vm0, %v1420_v1  ;;  %1312 = vmatpush3.bf16.msra.mxu1 %v1348_v27 }
 0x98f   :  { %1313 = vmatprep.subr.bf16.mxu1 %v1420_v1 }
 0x992   :  { %1314 = vmatpush3.bf16.msra.mxu1 %v1349_v28  ;;  %v1183_v28 = vld [vmem:[%s1761_s13] ss:$0 sm:$0xff] }
 0x993   :  { %1315 = vmatprep.subr.bf16.mxu1 %v1420_v1 }
 0x996   :  { %1316 = vmatpush3.bf16.msra.mxu1 %v1350_v29 }
 0x997   :  { %1317 = vmatprep.subr.bf16.mxu1 %v1420_v1 }
 0x99a   :  { %1318 = vmatpush3.bf16.msra.mxu1 %v1351_v32 }
 0x99b   :  { %1319 = vmatprep.subr.bf16.mxu1 %v1420_v1 }
 0x99e   :  { %1320 = vmatpush3.bf16.msra.mxu1 %v1352_v33 }
 0x99f   :  { %1321 = vmatprep.subr.bf16.mxu1 %v1420_v1 }
 0x9a2   :  { %1322 = vmatpush3.bf16.msra.mxu1 %v1353_v34 }
 0x9a3   :  { %1323 = vmatprep.subr.bf16.mxu1 %v1420_v1 }
 0xa60   :  { %v838_v62 = vpop.f32.mrb[16].mxu1 }
 0xa61   :  { %v845_v0 = vadd.f32 %v838_v62, %v673_v45  ;;  %v1301_v2 = vpop.f32.mrb[17].mxu1 }
 0xa62   :  { %v841_v5 = vpop.f32.mrb[18].mxu1 }
 0xa63   :  { %v854_v6 = vadd.f32 %v1166_v63, %v845_v0  ;;  %v846_v7 = vadd.f32 %v841_v5, %v674_v49  ;;  %v1302_v8 = vpop.f32.mrb[19].mxu1  ;;  %v1354_v49 = vld [vmem:[%s1758_s10 + $0x30] sm:$0xff]  }
 0xa64   :  { %1324 = vmatpush3.bf16.msra.mxu1 %v1354_v49 }
 0xa65   :  { %v855_v9 = vadd.f32 %v1166_v63, %v846_v7  ;;  %v856_v10 = vadd.f32 %v854_v6, %v1521_v3  ;;  %1325 = vmatprep.subr.bf16.mxu1 %v1420_v1 }
 0xa67   :  { %v860_v11 = vsel %vm75_vm1, %v856_v10, 0.0  ;;  %v857_v12 = vadd.f32 %v855_v9, %v1526_v4  ;;  %v1346_v4 = vld [vmem:[%s1756_s8] sm:$0xff]  }
 0xa68   :  { %861 = vadd.xlane.f32.xlu1 %v860_v11  ;;  %1304 = vmatpush3.bf16.msra.mxu0 %v1346_v4 }
 0xa69   :  { %v863_v14 = vsel %vm75_vm1, %v857_v12, 0.0  ;;  %1305 = vmatprep.subr.bf16.mxu0 %v1420_v1  ;;  %1326 = vmatpush3.bf16.msra.mxu1 %v1355_v50  ;;  %v1173_v1 = vld [vmem:[%s1759_s11] ss:$0 sm:$0xff] }
 0xa6c   :  { %864 = vadd.xlane.f32.xlu1 %v863_v14  ;;  %1306 = vmatpush3.bf16.msra.mxu0 %v1347_v26  ;;  %v1182_v26 = vld [vmem:[%s1760_s12] ss:$0 sm:$0xff] }
 0xaf5   :  { %v862_v15 = vpop.xlane.xlu1 %861 }
 0xaf6   :  { %v867_v16 = vmul.f32 0.03125, %v862_v15 }
 0xaf8   :  { %v869_v17 = vsub.f32 %v856_v10, %v867_v16 }
 0xaf9   :  { %v865_v18 = vpop.xlane.xlu1 %864 }
 0xafa   :  { %v868_v19 = vmul.f32 0.03125, %v865_v18  ;;  %v871_v21 = vmul.f32 %v869_v17, %v869_v17 }
 0xafc   :  { %v870_v23 = vsub.f32 %v857_v12, %v868_v19  ;;  %v873_v24 = vsel %vm75_vm1, %v871_v21, 0.0 }
 0xafd   :  { %874 = vadd.xlane.f32.xlu1 %v873_v24 }
 0xafe   :  { %v872_v25 = vmul.f32 %v870_v23, %v870_v23 }
 0xb00   :  { %v876_v3 = vsel %vm75_vm1, %v872_v25, 0.0 }
 0xb01   :  { %877 = vadd.xlane.f32.xlu1 %v876_v3 }
 0xb8a   :  { %v875_v35 = vpop.xlane.xlu1 %874 }
 0xb8b   :  { %v879_v36 = vmul.f32 0.03125, %v875_v35 }
 0xb8d   :  { %v881_v37 = vadd.f32 1e-05, %v879_v36 }
 0xb8e   :  { %v878_v38 = vpop.xlane.xlu1 %877 }
 0xb8f   :  { %1388 = vrsqrt.f32 %v881_v37  ;;  %v880_v39 = vmul.f32 0.03125, %v878_v38 }
 0xb91   :  { %v882_v20 = vadd.f32 1e-05, %v880_v39 }
 0xb93   :  { %1390 = vrsqrt.f32 %v882_v20 }
 0xb99   :  { %v1389_v40 = vpop.eup %1388 }
 0xb9a   :  { %v885_v30 = vmul.f32 %v1389_v40, %v869_v17 }
 0xb9c   :  { %v893_v41 = vmul.f32 %v1167_v22, %v885_v30 }
 0xb9d   :  { %v1391_v31 = vpop.eup %1390 }
 0xb9e   :  { %v886_v42 = vmul.f32 %v1391_v31, %v870_v23  ;;  %v901_v45 = vadd.f32 %v1168_v13, %v893_v41 }
 0xba0   :  { %v894_v44 = vmul.f32 %v1167_v22, %v886_v42 }
 0xba2   :  { %v902_v47 = vadd.f32 %v1168_v13, %v894_v44 }
 0xba4   :  { %v903_v48 = vpack.c.bf16 %v902_v47, %v901_v45 }
 0xba6   :  { %1308 = vmatmul.mubr.msk.bf16.vlgmr.msra.gmra.mrb[32].mxu0 %vm75_vm1, %v903_v48 }
 0xc79   :  { %v964_v52 = vpop.f32.mrb[32].mxu0 }
 0xc7a   :  { %v965_v53 = vadd.f32 %v1169_v51, %v964_v52  ;;  %v1309_v54 = vpop.f32.mrb[33].mxu0 }
 0xc7b   :  { %v967_v55 = vpop.f32.mrb[34].mxu0 }
 0xc7c   :  { %v968_v43 = vadd.f32 %v1169_v51, %v967_v55  ;;  %v1310_v56 = vpop.f32.mrb[35].mxu0  ;;  %v971_v57 = vmax.f32 %v965_v53, 0.0 }
 0xc7e   :  { %v972_v58 = vmax.f32 %v968_v43, 0.0 }
 0xc80   :  { %v973_v46 = vpack.c.bf16 %v972_v58, %v971_v57 }
 0xc82   :  { %1328 = vmatmul.mubr.bf16.vlgmr.msra.gmra.mrb[20].mxu1 %v973_v46 }
 0xd55   :  { %v1079_v59 = vpop.f32.mrb[20].mxu1 }
 0xd56   :  { %v1080_v60 = vadd.f32 %v1173_v1, %v1079_v59  ;;  %v1329_v61 = vpop.f32.mrb[21].mxu1 }
 0xd57   :  { %v1082_v62 = vpop.f32.mrb[22].mxu1 }
 0xd58   :  { %v1083_v63 = vadd.f32 %v1173_v1, %v1082_v62  ;;  %v1330_v0 = vpop.f32.mrb[23].mxu1  ;;  %v1086_v2 = vadd.f32 %v1080_v60, %v901_v45 }
 0xd5a   :  { %v1090_v5 = vsel %vm75_vm1, %v1086_v2, 0.0  ;;  %v1087_v6 = vadd.f32 %v1083_v63, %v902_v47 }
 0xd5b   :  { %1091 = vadd.xlane.f32.xlu1 %v1090_v5 }
 0xd5c   :  { %v1093_v7 = vsel %vm75_vm1, %v1087_v6, 0.0 }
 0xd5f   :  { %1094 = vadd.xlane.f32.xlu1 %v1093_v7 }
 0xde8   :  { %v1092_v8 = vpop.xlane.xlu1 %1091 }
 0xde9   :  { %v1096_v9 = vmul.f32 0.03125, %v1092_v8 }
 0xdeb   :  { %v1098_v10 = vsub.f32 %v1086_v2, %v1096_v9 }
 0xdec   :  { %v1095_v11 = vpop.xlane.xlu1 %1094 }
 0xded   :  { %v1097_v12 = vmul.f32 0.03125, %v1095_v11  ;;  %v1100_v14 = vmul.f32 %v1098_v10, %v1098_v10 }
 0xdef   :  { %v1099_v15 = vsub.f32 %v1087_v6, %v1097_v12  ;;  %v1102_v16 = vsel %vm75_vm1, %v1100_v14, 0.0 }
 0xdf0   :  { %1103 = vadd.xlane.f32.xlu1 %v1102_v16 }
 0xdf1   :  { %v1101_v17 = vmul.f32 %v1099_v15, %v1099_v15 }
 0xdf3   :  { %v1105_v18 = vsel %vm75_vm1, %v1101_v17, 0.0 }
 0xdf4   :  { %1106 = vadd.xlane.f32.xlu0 %v1105_v18 }
 0xe7d   :  { %v1104_v19 = vpop.xlane.xlu1 %1103 }
 0xe7e   :  { %v1108_v21 = vmul.f32 0.03125, %v1104_v19 }
 0xe80   :  { %v1110_v23 = vadd.f32 1e-05, %v1108_v21 }
 0xe81   :  { %v1107_v24 = vpop.xlane.xlu0 %1106 }
 0xe82   :  { %1392 = vrsqrt.f32 %v1110_v23  ;;  %v1109_v25 = vmul.f32 0.03125, %v1107_v24 }
 0xe84   :  { %v1111_v3 = vadd.f32 1e-05, %v1109_v25 }
 0xe86   :  { %1394 = vrsqrt.f32 %v1111_v3 }
 0xe8c   :  { %v1393_v4 = vpop.eup %1392 }
 0xe8d   :  { %v1114_v27 = vmul.f32 %v1393_v4, %v1098_v10 }
 0xe8f   :  { %v1122_v29 = vmul.f32 %v1182_v26, %v1114_v27 }
 0xe90   :  { %v1395_v32 = vpop.eup %1394 }
 0xe91   :  { %v1115_v33 = vmul.f32 %v1395_v32, %v1099_v15  ;;  %v1130_v34 = vadd.f32 %v1183_v28, %v1122_v29 }
 0xe93   :  { %v1123_v35 = vmul.f32 %v1182_v26, %v1115_v33  ;;  %1132 = vst.msk [vmem:[#allocation2] sm:$0xff] %vm75_vm1, %v1130_v34 }
 0xe95   :  { %v1131_v36 = vadd.f32 %v1183_v28, %v1123_v35 }
 0xe97   :  { %1133 = vst.msk [vmem:[#allocation2 + $0x8] sm:$0xff] %vm75_vm1, %v1131_v36 }
 0xe98   :  { %1407 = shalt.err (!%p1404_p4)
}
 0xe99   :  { %s1408_s1 = scalar_lea.hbm %s1762_s14, 256 }
 0xe9a   :  { %p1409_p5 = scmp.ne.s32.totalorder %s1762_s14, %s1408_s1  ;;  %p1412_p6 = scmp.lt.u32.totalorder %s1408_s1, %s1762_s14 }
 0xe9c   :  { %p1414_p7 = pnand %p1412_p6, %p1409_p5 }
 0xe9e   :  { %1417 = shalt.err (!%p1414_p7)
}
 0xe9f   :  { %s1431_s30 = smov 128   ;;  %s1432_s15 = smov 8  }
 0xea0   :  { %1145 = dma.vmem_to_hbm [thread:$0]  %s1140_s25, 256, %s1762_s14, [#allocation3], %s1431_s30, %s1431_s30, %s1432_s15  }
 0xea1   :  { %1418 = dma.done.wait [#allocation3], 256  }
 0xea2   :  { %1419 = vsyncadd [#allocation3], 4294967040 }
 0xea3   :  { %1149 = vsyncpa [#allocation3], 1 }

</bundles_post_ra>
